<compile_context>
chip_gen: v7x
topology: tpu7x:2x2x1
jax: 0.10.0
libtpu: 0.0.40
codegen_flags: <defaults>
</compile_context>

<pallas_src>
from functools import partial

import jax
import jax.numpy as jnp
from jax.experimental import pallas as pl
from jax.experimental.pallas import tpu as pltpu

VOCAB = 3          # labels: 0 = unknown (padding), 1, 2 = the two speakers
SPEAKER_DIM = 20

# N below this uses the plain-XLA gather fast path (launch overhead dominates).
_MIN_PALLAS_N = 1024
# N at or above this forces >= 2 grid steps so both v7x TensorCores get work.
_MULTI_STEP_N = 2048


def _round_up(x, m):
    return ((x + m - 1) // m) * m


def _cdiv(a, b):
    return -(-a // b)


def speaker_embed_kernel(labels_ref, table_ref, out_ref):
    """Embedding lookup via VPU selects (no MXU), emitting (TM, D) directly.

    labels_ref : (TM, 1)        int32   in VMEM  (streamed row tile of labels)
    table_ref  : (VOCAB=3, D)   float32 in VMEM  (resident table)
    out_ref    : (TM, D)        out_dtype in VMEM
    """
    tm, d = out_ref.shape
    lab = labels_ref[...]                                    # (TM, 1) int32

    # Label predicates broadcast across the lane axis: (TM, 1) -> (TM, D).
    is1 = jnp.broadcast_to(lab == 1, (tm, d))
    is2 = jnp.broadcast_to(lab == 2, (tm, d))

    # Table rows broadcast across the sublane axis: (1, D) -> (TM, D).
    r0 = jnp.broadcast_to(table_ref[0:1, :], (tm, d))
    r1 = jnp.broadcast_to(table_ref[1:2, :], (tm, d))
    r2 = jnp.broadcast_to(table_ref[2:3, :], (tm, d))

    # label==1 -> row1, label==2 -> row2, otherwise row0 (padding row).
    out = jnp.where(is1, r1, jnp.where(is2, r2, r0))
    out_ref[...] = out.astype(out_ref.dtype)


def init_speaker_params(key, speaker_dim=SPEAKER_DIM):
    """Deterministic stand-in for nn.Embedding(3, speaker_dim, padding_idx=0)."""
    table = jax.random.normal(key, (VOCAB, speaker_dim), dtype=jnp.float32)
    # padding_idx=0 -> row 0 is all zeros ("speaker unknown")
    table = table.at[0].set(0.0)
    return table


@partial(jax.jit, static_argnames=("tm", "grid_m", "out_dtype"))
def _pallas_embed(labels, table, *, tm, grid_m, out_dtype):
    """Jitted pad + pallas_call + slice so padding/slicing fuse with the call."""
    n = labels.shape[0]
    vocab, d = table.shape
    n_pad = tm * grid_m

    labels2d = labels.reshape(n, 1)
    if n_pad != n:
        labels2d = jnp.pad(labels2d, ((0, n_pad - n), (0, 0)))

    out = pl.pallas_call(
        speaker_embed_kernel,
        out_shape=jax.ShapeDtypeStruct((n_pad, d), out_dtype),
        grid=(grid_m,),
        in_specs=[
            pl.BlockSpec((tm, 1), lambda i: (i, 0)),        # labels, streamed
            pl.BlockSpec((vocab, d), lambda i: (0, 0)),     # table, resident
        ],
        out_specs=pl.BlockSpec((tm, d), lambda i: (i, 0)),  # (N, D) directly
        compiler_params=pltpu.CompilerParams(
            dimension_semantics=("parallel",),   # v7x: shard N across both TCs
        ),
    )(labels2d, table)

    return out[:n] if n_pad != n else out


def speaker_forward(speaker_labels, table, *, block_m=4096,
                    out_dtype=jnp.float32, force_pallas=False):
    """speaker_labels: 1-D int array-like of length N with values in {0,1,2}.

    Returns (N, D) embeddings (eval-mode: Dropout is identity).
    """
    labels = jnp.asarray(speaker_labels, dtype=jnp.int32).reshape(-1)   # (N,)
    n = labels.shape[0]

    # Small-N fast path: XLA's fused gather beats kernel launch + pad overhead.
    if n < _MIN_PALLAS_N and not force_pallas:
        return jnp.take(table, labels, axis=0).astype(out_dtype)

    # Tile selection with bounded padding waste; >= 2 steps for large N so a
    # dual-TC chip (v7x) can shard the parallel grid axis.
    block_m = max(8, _round_up(block_m, 8))
    grid_m = max(1, _cdiv(n, block_m))
    if n >= _MULTI_STEP_N and grid_m < 2:
        grid_m = 2
    tm = _round_up(_cdiv(n, grid_m), 8)

    return _pallas_embed(labels, table, tm=tm, grid_m=grid_m, out_dtype=out_dtype)


if __name__ == "__main__":
    key = jax.random.PRNGKey(0)
    k_table, k_labels, k_labels2 = jax.random.split(key, 3)

    table = init_speaker_params(k_table, SPEAKER_DIM)

    # Small, deterministic example: seq of 8 speaker labels in {0,1,2}.
    # force_pallas=True so the Pallas kernel itself is exercised at small N.
    labels = jax.random.randint(k_labels, (8,), minval=0, maxval=VOCAB, dtype=jnp.int32)
    out = jax.block_until_ready(speaker_forward(labels, table, force_pallas=True))

    # Reference check in plain JAX: table[labels] (row 0 is zeroed).
    ref = jnp.take(table, labels, axis=0)
    assert out.shape == (8, SPEAKER_DIM)
    assert jnp.allclose(out, ref, atol=0.0), "mismatch vs. reference gather"
    # padding rows must be exactly zero
    assert jnp.all(jnp.where(labels[:, None] == 0, out, 0.0) == 0.0)

    # Second check: longer sequence with a small block to exercise the grid
    # (multiple row tiles + remainder padding/slicing).
    labels2 = jax.random.randint(k_labels2, (300,), minval=0, maxval=VOCAB, dtype=jnp.int32)
    out2 = jax.block_until_ready(
        speaker_forward(labels2, table, block_m=128, force_pallas=True))
    ref2 = jnp.take(table, labels2, axis=0)
    assert out2.shape == (300, SPEAKER_DIM)
    assert jnp.allclose(out2, ref2, atol=0.0), "mismatch vs. reference gather (tiled)"

    # Third check: the small-N fast path agrees with the kernel path.
    out_fast = jax.block_until_ready(speaker_forward(labels, table))
    assert jnp.allclose(out_fast, out, atol=0.0), "fast path / kernel path mismatch"

    print("KERNEL_OK")
</pallas_src>

<mosaic_0001>
module attributes {stable_mosaic.version = 11 : i64} {
  func.func @speaker_embed_kernel(%arg0: i32, %arg1: memref<8x1xi32, #tpu.memory_space<vmem>>, %arg2: memref<3x20xf32, #tpu.memory_space<vmem>>, %arg3: memref<8x20xf32, #tpu.memory_space<vmem>>) attributes {dimension_semantics = [#tpu.dimension_semantics<parallel>], iteration_bounds = array<i64: 1>, scalar_prefetch = 0 : i64, scratch_operands = 0 : i64, tpu.core_type = #tpu.core_type<tc>, window_params = [{transform_indices = @transform_0, window_bounds = array<i64: 8, 1>}, {pipeline_mode = #tpu.pipeline_mode<synchronous>, transform_indices = @transform_1, window_bounds = array<i64: 3, 20>}, {transform_indices = @transform_2, window_bounds = array<i64: 8, 20>}]} {
    %c0 = arith.constant 0 : index
    %c0_0 = arith.constant 0 : index
    %0 = vector.load %arg1[%c0, %c0_0] : memref<8x1xi32, #tpu.memory_space<vmem>>, vector<8x1xi32>
    %c1_i32 = arith.constant 1 : i32
    %1 = vector.broadcast %c1_i32 : i32 to vector<8x1xi32>
    %2 = arith.cmpi eq, %0, %1 : vector<8x1xi32>
    %3 = vector.shape_cast %2 : vector<8x1xi1> to vector<8x1xi1>
    %4 = vector.broadcast %3 : vector<8x1xi1> to vector<8x20xi1>
    %c2_i32 = arith.constant 2 : i32
    %5 = vector.broadcast %c2_i32 : i32 to vector<8x1xi32>
    %6 = arith.cmpi eq, %0, %5 : vector<8x1xi32>
    %7 = vector.shape_cast %6 : vector<8x1xi1> to vector<8x1xi1>
    %8 = vector.broadcast %7 : vector<8x1xi1> to vector<8x20xi1>
    %c0_1 = arith.constant 0 : index
    %c0_2 = arith.constant 0 : index
    %9 = vector.load %arg2[%c0_1, %c0_2] : memref<3x20xf32, #tpu.memory_space<vmem>>, vector<1x20xf32>
    %10 = vector.shape_cast %9 : vector<1x20xf32> to vector<1x20xf32>
    %11 = vector.broadcast %10 : vector<1x20xf32> to vector<8x20xf32>
    %c1 = arith.constant 1 : index
    %c0_3 = arith.constant 0 : index
    %12 = vector.load %arg2[%c1, %c0_3] : memref<3x20xf32, #tpu.memory_space<vmem>>, vector<1x20xf32>
    %13 = vector.shape_cast %12 : vector<1x20xf32> to vector<1x20xf32>
    %14 = vector.broadcast %13 : vector<1x20xf32> to vector<8x20xf32>
    %c2 = arith.constant 2 : index
    %c0_4 = arith.constant 0 : index
    %15 = vector.load %arg2[%c2, %c0_4] : memref<3x20xf32, #tpu.memory_space<vmem>>, vector<1x20xf32>
    %16 = vector.shape_cast %15 : vector<1x20xf32> to vector<1x20xf32>
    %17 = vector.broadcast %16 : vector<1x20xf32> to vector<8x20xf32>
    %18 = arith.select %8, %17, %11 : vector<8x20xi1>, vector<8x20xf32>
    %19 = arith.select %4, %14, %18 : vector<8x20xi1>, vector<8x20xf32>
    %c0_5 = arith.constant 0 : index
    %c0_6 = arith.constant 0 : index
    %20 = vector.load %arg3[%c0_5, %c0_6] : memref<8x20xf32, #tpu.memory_space<vmem>>, vector<8x20xf32>
    tpu.vector_store %arg3[%c0_5, %c0_6], %19 {strides = array<i32>} : memref<8x20xf32, #tpu.memory_space<vmem>>, vector<8x20xf32>,
    return
  }
  func.func @transform_0(%arg0: i32) -> (i32, i32) {
    %c0_i32 = arith.constant 0 : i32
    %c0_i32_0 = arith.constant 0 : i32
    return %arg0, %c0_i32 : i32, i32
  }
  func.func @transform_1(%arg0: i32) -> (i32, i32) {
    %c0_i32 = arith.constant 0 : i32
    %c0_i32_0 = arith.constant 0 : i32
    %c0_i32_1 = arith.constant 0 : i32
    return %c0_i32, %c0_i32_0 : i32, i32
  }
  func.func @transform_2(%arg0: i32) -> (i32, i32) {
    %c0_i32 = arith.constant 0 : i32
    %c0_i32_0 = arith.constant 0 : i32
    return %arg0, %c0_i32 : i32, i32
  }
}

</mosaic_0001>

<bundles_post_ra>
// kernel: _pallas_embed.1
= control target key start
LH: loop header
LB: loop body
LE: loop exit
PB: predicated region body
PF: predicated region fallthrough
CT: control target
= control target key end

     0   :  { %v88_v1 = vmov 0   ;;  %s129_s0 = inlined_call_operand.vmem [shape: s32[8,1], index: 0, kind: input, shape index: {}]   ;;  %s130_s1 = inlined_call_operand.vmem [shape: f32[3,20], index: 1, kind: input, shape index: {}]   ;;  %s131_s2 = inlined_call_operand.hbm [shape: f32[8,20], index: 2, kind: output, shape index: {}]  }
   0x1   :  { %v12_v0 = vld [vmem:[%s129_s0] sm:$0xff]  ;;  %63 = vset.pattern.permute.xlu0 %v88_v1 }
   0x2   :  { %vm19_vm0 = vcmp.eq.s32.totalorder %v12_v0, 2  ;;  %vm13_vm1 = vcmp.eq.s32.totalorder %v12_v0, 1 }
   0x3   :  { %7 = vsyncpa [#allocation3], 0  ;;  %v20_v2 = vsel %vm19_vm0, 1, %v88_v1  ;;  %v14_v3 = vsel %vm13_vm1, 1, %v88_v1  ;;  %v58_v5 = vld [vmem:[%s130_s1] ss:$0 sm:$0xff] }
   0x4   :  { %22 = vperm.xlu0 %63, %v20_v2   ;;  %v60_v6 = vld [vmem:[%s130_s1 + $0x2] ss:$0 sm:$0xff]  ;;  %s89_s0 = smov [#allocation2]   ;;  %v59_v7 = vld [vmem:[%s130_s1 + $0x1] ss:$0 sm:$0xff]  ;;  %vm42_vm3 = vcmask 162816  }
   0x5   :  { %s50_s15 = sshll.u32 %s89_s0, 4  ;;  %s51_s15 = int_to_ptr.vmem [resolvable:$true] %s50_s15 }
   0x6   :  { %s64_s18 = scalar_lea.vmem %s51_s15, 128  ;;  %p69_p1 = scmp.lt.s32.totalorder %s51_s15, %s51_s15 }
   0x7   :  { %p65_p0 = scmp.ne.s32.totalorder %s51_s15, %s64_s18  ;;  %p70_p2 = scmp.lt.s32.totalorder %s64_s18, %s64_s18 }
   0x8   :  { %16 = vperm.xlu0 %63, %v14_v3  }
   0x9   :  { %p71_p3 = por %p70_p2, %p69_p1 }
   0xb   :  { %p72_p4 = pnand %p71_p3, %p65_p0 }
  0x83   :  { %v23_v4 = vpop.permute.xlu0 %22 }
  0x84   :  { %vm24_vm2 = vcmp.eq.s32.totalorder %v23_v4, 1 }
  0x85   :  { %v40_v9 = vsel %vm24_vm2, %v60_v6, %v58_v5 }
  0x87   :  { %v17_v8 = vpop.permute.xlu0 %16 }
  0x88   :  { %vm18_vm4 = vcmp.eq.s32.totalorder %v17_v8, 1 }
  0x89   :  { %v41_v10 = vsel %vm18_vm4, %v59_v7, %v40_v9 }
  0x8a   :  { %43 = vst.msk [vmem:[#allocation2] sm:$0xff] %vm42_vm3, %v41_v10 }
  0x8b   :  { %75 = shalt.err (!%p72_p4)
}
  0x8c   :  { %s76_s21 = scalar_lea.hbm %s131_s2, 128 }
  0x8d   :  { %p77_p5 = scmp.ne.s32.totalorder %s131_s2, %s76_s21  ;;  %p80_p6 = scmp.lt.u32.totalorder %s76_s21, %s131_s2 }
  0x8f   :  { %p82_p7 = pnand %p80_p6, %p77_p5 }
  0x91   :  { %85 = shalt.err (!%p82_p7)
}
  0x92   :  { %53 = dma.vmem_to_hbm [thread:$0]  %s51_s15, 128, %s131_s2, [#allocation3]  }
  0x93   :  { %86 = dma.done.wait [#allocation3], 128  }
  0x94   :  { %87 = vsyncadd [#allocation3], 4294967168 }
  0x95   :  { %57 = vsyncpa [#allocation3], 1 }

</bundles_post_ra>
